<compile_context>
chip_gen: v7x
topology: tpu7x:2x2x1
jax: 0.10.0
libtpu: 0.0.40
codegen_flags: <defaults>
</compile_context>

<pallas_src>
import functools

import jax
import jax.numpy as jnp
from jax.experimental import pallas as pl
from jax.experimental.pallas import tpu as pltpu


def make_divisible(v, divisor, min_value=None):
    if min_value is None:
        min_value = divisor
    new_v = max(min_value, int(v + divisor / 2) // divisor * divisor)
    if new_v < 0.9 * v:
        new_v += divisor
    return new_v


# -----------------------------------------------------------------------------
# Trace-time hardware queries (guarded; conservative fallbacks).
# -----------------------------------------------------------------------------

def _vmem_capacity_bytes():
    try:
        return int(pltpu.get_tpu_info().vmem_capacity_bytes)
    except Exception:
        return 64 * 1024 * 1024          # conservative: v7x per-TensorCore size


def _device_kind():
    try:
        return jax.devices()[0].device_kind.lower()
    except Exception:
        return ""


def _is_v5():
    # v5-generation VALUs have no bf16 arithmetic -> keep the gate apply in f32.
    return "v5" in _device_kind()


def _is_two_tensorcore():
    # v7x has 2 TensorCores per chip; v5e/v6e have 1.
    return "7" in _device_kind()


def _vmem_plan():
    cap = _vmem_capacity_bytes()
    # Scoped VMEM we ask Mosaic for (<= half of physical, capped at 64 MiB),
    # and the slice of it our blocked x (in + out, double-buffered, plus f32
    # working set) is allowed to occupy.
    vmem_limit = min(cap // 2, 64 * 1024 * 1024)
    block_budget = vmem_limit // 2
    return vmem_limit, block_budget


def _per_batch_block_bytes(C, HW, itemsize):
    # x in + out, each double-buffered by the pipeline, plus a transient f32
    # working buffer (cast-for-reduction / f32 product) when storage < f32.
    io = 2 * 2 * C * HW * itemsize
    f32_work = C * HW * 4 if itemsize < 4 else 0
    return io + f32_work


def _choose_hw_tile(C, HW, itemsize, budget):
    # HW tile width for the two-pass fallback: a multiple of 128 that fits the
    # budget, kept <= HW (the last tile may be ragged; kernels mask / truncate).
    if HW <= 128:
        return HW                         # full (possibly unaligned) extent is allowed
    per_128 = 2 * 2 * C * 128 * itemsize + (C * 128 * 4 if itemsize < 4 else 0)
    k = max(1, budget // per_128)
    k = min(k, HW // 128)
    return int(k) * 128


# -----------------------------------------------------------------------------
# Kernels
# -----------------------------------------------------------------------------

def _se_single_pass_kernel(x_ref, wrt_ref, br_ref, wet_ref, be_ref, o_ref, *,
                           inv_hw, gate_in_storage_dtype):
    # x_ref block: (nb, C, HW)  wrt: (C, Cr)  br: (1, Cr)  wet: (Cr, C)  be: (1, C)

    # AdaptiveAvgPool2d(1): f32-accumulated lane reduction over the full HW
    # extent (Mosaic masks padded physical tail lanes of an unaligned dim), so
    # no materialized f32 copy of the tile is kept alive.
    pooled = jnp.sum(x_ref[...], axis=2, dtype=jnp.float32) * inv_hw        # (nb, C)

    # conv_reduce (1x1) + bias + ReLU, conv_expand (1x1) + bias: plain MXU dots
    # on pre-transposed f32 weights (these sit in MXU slack).
    r = jnp.dot(pooled, wrt_ref[...], preferred_element_type=jnp.float32)
    r = jnp.maximum(r + br_ref[...], 0.0)                                    # (nb, Cr)
    e = jnp.dot(r, wet_ref[...], preferred_element_type=jnp.float32)
    gate = jax.nn.sigmoid(e + be_ref[...])                                   # (nb, C) f32

    x = x_ref[...]                                                           # re-read, storage dtype
    if gate_in_storage_dtype:
        # bf16 gate apply (v6e / v7x): halves the per-element VPU/VMEM work.
        o_ref[...] = x * gate.astype(o_ref.dtype)[:, :, None]
    else:
        # f32 gate apply (v5e or f32 storage).
        o_ref[...] = (x.astype(jnp.float32) * gate[:, :, None]).astype(o_ref.dtype)


def _pool_sum_kernel(x_ref, sum_ref, *, hw, thw):
    # Two-pass fallback, pass 1: accumulate per-(n, c) spatial sums in f32
    # across HW tiles.  The last tile may be ragged -> mask with a lane iota.
    j = pl.program_id(1)

    @pl.when(j == 0)
    def _():
        sum_ref[...] = jnp.zeros_like(sum_ref)

    x = x_ref[...]                                                           # (1, C, thw)
    lane = jax.lax.broadcasted_iota(jnp.int32, x.shape, 2)
    valid = (j * thw + lane) < hw
    xm = jnp.where(valid, x, jnp.zeros((), x.dtype))
    sum_ref[...] += jnp.sum(xm, axis=2, dtype=jnp.float32)[:, None, :]       # (1, 1, C)


def _gate_apply_kernel(pooled_ref, wrt_ref, br_ref, wet_ref, be_ref, x_ref, o_ref, *,
                       inv_hw, gate_in_storage_dtype):
    # Two-pass fallback, pass 2: recompute the (tiny) gate per block and apply
    # it to the streamed HW tile.  Out-of-range writes of a ragged tile are
    # truncated by Pallas.
    pooled = pooled_ref[...][:, 0, :] * inv_hw                               # (1, C) f32
    r = jnp.dot(pooled, wrt_ref[...], preferred_element_type=jnp.float32)
    r = jnp.maximum(r + br_ref[...], 0.0)
    e = jnp.dot(r, wet_ref[...], preferred_element_type=jnp.float32)
    gate = jax.nn.sigmoid(e + be_ref[...])                                   # (1, C) f32

    x = x_ref[...]                                                           # (1, C, thw)
    if gate_in_storage_dtype:
        o_ref[...] = x * gate.astype(o_ref.dtype)[:, :, None]
    else:
        o_ref[...] = (x.astype(jnp.float32) * gate[:, :, None]).astype(o_ref.dtype)


# -----------------------------------------------------------------------------
# Wrapper
# -----------------------------------------------------------------------------

def squeeze_excite(x_nchw, w_reduce, b_reduce, w_expand, b_expand, *,
                   force_two_pass=False):
    """SqueezeExcite forward pass (matches the PyTorch module).

    x_nchw:   (N, C, H, W), float32 or bfloat16 (gate math is always f32).
    w_reduce: (Cr, C) or (Cr, C, 1, 1) -- conv_reduce 1x1 kernel.
    b_reduce: (Cr,) or (Cr, 1).
    w_expand: (C, Cr) or (C, Cr, 1, 1) -- conv_expand 1x1 kernel.
    b_expand: (C,) or (C, 1).
    """
    N, C, H, W = x_nchw.shape
    Cr = w_reduce.shape[0]
    HW = H * W
    inv_hw = 1.0 / float(HW)

    x_flat = x_nchw.reshape(N, C, HW)
    itemsize = jnp.dtype(x_nchw.dtype).itemsize

    # Pre-transposed weights / lane-dense biases: kernels do plain dots with no
    # in-kernel relayouts of the small operands.
    wrt = jnp.asarray(w_reduce, jnp.float32).reshape(Cr, C).T               # (C, Cr)
    wet = jnp.asarray(w_expand, jnp.float32).reshape(C, Cr).T               # (Cr, C)
    br = jnp.asarray(b_reduce, jnp.float32).reshape(1, Cr)                  # (1, Cr)
    be = jnp.asarray(b_expand, jnp.float32).reshape(1, C)                   # (1, C)

    storage_is_f32 = itemsize >= 4
    gate_in_storage = (not storage_is_f32) and (not _is_v5())

    vmem_limit, block_budget = _vmem_plan()
    per_batch = _per_batch_block_bytes(C, HW, itemsize)
    single_pass_ok = (per_batch <= block_budget) and (not force_two_pass)

    if single_pass_ok:
        nb = max(1, block_budget // per_batch)
        if _is_two_tensorcore() and N >= 2:
            nb = min(nb, pl.cdiv(N, 2))       # >= 2 grid steps so both TCs get work
        nb = int(min(nb, N))

        kernel = functools.partial(_se_single_pass_kernel, inv_hw=inv_hw,
                                   gate_in_storage_dtype=gate_in_storage)
        out = pl.pallas_call(
            kernel,
            out_shape=jax.ShapeDtypeStruct((N, C, HW), x_nchw.dtype),
            grid_spec=pltpu.PrefetchScalarGridSpec(
                num_scalar_prefetch=0,
                grid=(pl.cdiv(N, nb),),
                in_specs=[
                    pl.BlockSpec((nb, C, HW), lambda n: (n, 0, 0)),
                    pl.BlockSpec((C, Cr), lambda n: (0, 0)),
                    pl.BlockSpec((1, Cr), lambda n: (0, 0)),
                    pl.BlockSpec((Cr, C), lambda n: (0, 0)),
                    pl.BlockSpec((1, C), lambda n: (0, 0)),
                ],
                out_specs=pl.BlockSpec((nb, C, HW), lambda n: (n, 0, 0)),
            ),
            compiler_params=pltpu.CompilerParams(
                dimension_semantics=("parallel",),
                vmem_limit_bytes=vmem_limit),
        )(x_flat, wrt, br, wet, be)
        return out.reshape(N, C, H, W)

    # ---- two-pass fallback: one batch row's (C, HW) block exceeds the budget ----
    thw = _choose_hw_tile(C, HW, itemsize, block_budget)
    nhw = pl.cdiv(HW, thw)

    pooled = pl.pallas_call(
        functools.partial(_pool_sum_kernel, hw=HW, thw=thw),
        out_shape=jax.ShapeDtypeStruct((N, 1, C), jnp.float32),
        grid_spec=pltpu.PrefetchScalarGridSpec(
            num_scalar_prefetch=0,
            grid=(N, nhw),
            in_specs=[pl.BlockSpec((1, C, thw), lambda i, j: (i, 0, j))],
            out_specs=pl.BlockSpec((1, 1, C), lambda i, j: (i, 0, 0)),
        ),
        compiler_params=pltpu.CompilerParams(
            dimension_semantics=("parallel", "arbitrary"),
            vmem_limit_bytes=vmem_limit),
    )(x_flat)

    out = pl.pallas_call(
        functools.partial(_gate_apply_kernel, inv_hw=inv_hw,
                          gate_in_storage_dtype=gate_in_storage),
        out_shape=jax.ShapeDtypeStruct((N, C, HW), x_nchw.dtype),
        grid_spec=pltpu.PrefetchScalarGridSpec(
            num_scalar_prefetch=0,
            grid=(N, nhw),
            in_specs=[
                pl.BlockSpec((1, 1, C), lambda i, j: (i, 0, 0)),
                pl.BlockSpec((C, Cr), lambda i, j: (0, 0)),
                pl.BlockSpec((1, Cr), lambda i, j: (0, 0)),
                pl.BlockSpec((Cr, C), lambda i, j: (0, 0)),
                pl.BlockSpec((1, C), lambda i, j: (0, 0)),
                pl.BlockSpec((1, C, thw), lambda i, j: (i, 0, j)),
            ],
            out_specs=pl.BlockSpec((1, C, thw), lambda i, j: (i, 0, j)),
        ),
        compiler_params=pltpu.CompilerParams(
            dimension_semantics=("parallel", "parallel"),
            vmem_limit_bytes=vmem_limit),
    )(pooled, wrt, br, wet, be, x_flat)
    return out.reshape(N, C, H, W)


def squeeze_excite_ref(x, wr, br, we, be):
    # Pure-JAX reference of the PyTorch forward (f32 math, then cast back).
    N, C = x.shape[0], x.shape[1]
    Cr = wr.shape[0]
    xf = x.astype(jnp.float32)
    wr = jnp.asarray(wr, jnp.float32).reshape(Cr, C)
    we = jnp.asarray(we, jnp.float32).reshape(C, Cr)
    pooled = jnp.mean(xf, axis=(2, 3))                                       # (N, C)
    r = jnp.maximum(pooled @ wr.T + jnp.asarray(br, jnp.float32).reshape(1, -1), 0.0)
    e = r @ we.T + jnp.asarray(be, jnp.float32).reshape(1, -1)
    gate = jax.nn.sigmoid(e)                                                 # (N, C)
    return (xf * gate[:, :, None, None]).astype(x.dtype)


if __name__ == "__main__":
    # Module config: in_chs=16, se_ratio=0.25, divisor=4 -> reduced_chs=4
    in_chs = 16
    reduced_chs = make_divisible(in_chs * 0.25, 4)       # = 4

    key = jax.random.PRNGKey(0)
    k_x, k_wr, k_br, k_we, k_be = jax.random.split(key, 5)

    w_reduce = 0.1 * jax.random.normal(k_wr, (reduced_chs, in_chs), dtype=jnp.float32)
    b_reduce = 0.1 * jax.random.normal(k_br, (reduced_chs,), dtype=jnp.float32)
    w_expand = 0.1 * jax.random.normal(k_we, (in_chs, reduced_chs), dtype=jnp.float32)
    b_expand = 0.1 * jax.random.normal(k_be, (in_chs,), dtype=jnp.float32)

    def check(x, force_two_pass, atol, rtol):
        out = squeeze_excite(x, w_reduce, b_reduce, w_expand, b_expand,
                             force_two_pass=force_two_pass)
        out = jax.block_until_ready(out)
        ref = squeeze_excite_ref(x, w_reduce, b_reduce, w_expand, b_expand)
        assert out.shape == x.shape
        err = jnp.max(jnp.abs(out.astype(jnp.float32) - ref.astype(jnp.float32)))
        assert jnp.allclose(out.astype(jnp.float32), ref.astype(jnp.float32),
                            atol=atol, rtol=rtol), float(err)

    # Case A: aligned spatial extent, f32, single-pass path.
    x_a = jax.random.normal(k_x, (2, in_chs, 16, 16), dtype=jnp.float32)
    check(x_a, force_two_pass=False, atol=1e-4, rtol=1e-4)

    # Case B: unaligned spatial extent (HW=225), N=3 (ragged batch block on
    # 2-TC parts), bf16 storage (gate applied in bf16 on v6e/v7x, f32 on v5e).
    x_b = jax.random.normal(k_x, (3, in_chs, 15, 15),
                            dtype=jnp.float32).astype(jnp.bfloat16)
    check(x_b, force_two_pass=False, atol=5e-2, rtol=5e-2)

    # Case C: the two-pass (HW-tiled) fallback used for very large C*HW,
    # forced here on a small shape to exercise its masking / ragged tiles.
    x_c = jax.random.normal(k_x, (3, in_chs, 15, 15), dtype=jnp.float32)
    check(x_c, force_two_pass=True, atol=1e-4, rtol=1e-4)

    print("KERNEL_OK")
</pallas_src>

<mosaic_0001>
module attributes {stable_mosaic.version = 11 : i64} {
  func.func @_se_single_pass_kernel(%arg0: i32, %arg1: memref<2x16x256xf32, #tpu.memory_space<vmem>>, %arg2: memref<16x4xf32, #tpu.memory_space<vmem>>, %arg3: memref<1x4xf32, #tpu.memory_space<vmem>>, %arg4: memref<4x16xf32, #tpu.memory_space<vmem>>, %arg5: memref<1x16xf32, #tpu.memory_space<vmem>>, %arg6: memref<2x16x256xf32, #tpu.memory_space<vmem>>) attributes {dimension_semantics = [#tpu.dimension_semantics<parallel>], iteration_bounds = array<i64: 1>, scalar_prefetch = 0 : i64, scratch_operands = 0 : i64, tpu.core_type = #tpu.core_type<tc>, window_params = [{transform_indices = @transform_0, window_bounds = array<i64: 2, 16, 256>}, {pipeline_mode = #tpu.pipeline_mode<synchronous>, transform_indices = @transform_1, window_bounds = array<i64: 16, 4>}, {pipeline_mode = #tpu.pipeline_mode<synchronous>, transform_indices = @transform_2, window_bounds = array<i64: 1, 4>}, {pipeline_mode = #tpu.pipeline_mode<synchronous>, transform_indices = @transform_3, window_bounds = array<i64: 4, 16>}, {pipeline_mode = #tpu.pipeline_mode<synchronous>, transform_indices = @transform_4, window_bounds = array<i64: 1, 16>}, {transform_indices = @transform_5, window_bounds = array<i64: 2, 16, 256>}]} {
    %c0 = arith.constant 0 : index
    %c0_0 = arith.constant 0 : index
    %c0_1 = arith.constant 0 : index
    %0 = vector.load %arg1[%c0, %c0_0, %c0_1] : memref<2x16x256xf32, #tpu.memory_space<vmem>>, vector<2x16x256xf32>
    %cst = arith.constant dense<0.000000e+00> : vector<2x16xf32>
    %1 = vector.multi_reduction <add>, %0, %cst [2] : vector<2x16x256xf32> to vector<2x16xf32>
    %cst_2 = arith.constant 3.906250e-03 : f32
    %2 = vector.broadcast %cst_2 : f32 to vector<2x16xf32>
    %3 = arith.mulf %1, %2 : vector<2x16xf32>
    %c0_3 = arith.constant 0 : index
    %c0_4 = arith.constant 0 : index
    %4 = vector.load %arg2[%c0_3, %c0_4] : memref<16x4xf32, #tpu.memory_space<vmem>>, vector<16x4xf32>
    %cst_5 = arith.constant dense<0.000000e+00> : vector<2x4xf32>
    %5 = tpu.matmul %3, %4, %cst_5 {dimension_numbers = #tpu.dot_dimension_numbers<[1], [0], [0], [1], [0, 0, 1, 1], [], []>} : vector<2x16xf32>, vector<16x4xf32>, vector<2x4xf32> -> vector<2x4xf32>
    %c0_6 = arith.constant 0 : index
    %c0_7 = arith.constant 0 : index
    %6 = vector.load %arg3[%c0_6, %c0_7] : memref<1x4xf32, #tpu.memory_space<vmem>>, vector<1x4xf32>
    %7 = vector.broadcast %6 : vector<1x4xf32> to vector<2x4xf32>
    %8 = arith.addf %5, %7 : vector<2x4xf32>
    %cst_8 = arith.constant 0.000000e+00 : f32
    %9 = vector.broadcast %cst_8 : f32 to vector<2x4xf32>
    %10 = arith.maximumf %8, %9 : vector<2x4xf32>
    %c0_9 = arith.constant 0 : index
    %c0_10 = arith.constant 0 : index
    %11 = vector.load %arg4[%c0_9, %c0_10] : memref<4x16xf32, #tpu.memory_space<vmem>>, vector<4x16xf32>
    %cst_11 = arith.constant dense<0.000000e+00> : vector<2x16xf32>
    %12 = tpu.matmul %10, %11, %cst_11 {dimension_numbers = #tpu.dot_dimension_numbers<[1], [0], [0], [1], [0, 0, 1, 1], [], []>} : vector<2x4xf32>, vector<4x16xf32>, vector<2x16xf32> -> vector<2x16xf32>
    %c0_12 = arith.constant 0 : index
    %c0_13 = arith.constant 0 : index
    %13 = vector.load %arg5[%c0_12, %c0_13] : memref<1x16xf32, #tpu.memory_space<vmem>>, vector<1x16xf32>
    %14 = vector.broadcast %13 : vector<1x16xf32> to vector<2x16xf32>
    %15 = arith.addf %12, %14 : vector<2x16xf32>
    %16 = arith.negf %15 : vector<2x16xf32>
    %17 = math.exp %16 : vector<2x16xf32>
    %cst_14 = arith.constant 1.000000e+00 : f32
    %18 = vector.broadcast %cst_14 : f32 to vector<2x16xf32>
    %19 = arith.addf %18, %17 : vector<2x16xf32>
    %20 = arith.divf %18, %19 : vector<2x16xf32>
    %c0_15 = arith.constant 0 : index
    %c0_16 = arith.constant 0 : index
    %c0_17 = arith.constant 0 : index
    %21 = vector.load %arg1[%c0_15, %c0_16, %c0_17] : memref<2x16x256xf32, #tpu.memory_space<vmem>>, vector<2x16x256xf32>
    %22 = vector.shape_cast %20 : vector<2x16xf32> to vector<2x16x1xf32>
    %23 = vector.broadcast %22 : vector<2x16x1xf32> to vector<2x16x256xf32>
    %24 = arith.mulf %21, %23 : vector<2x16x256xf32>
    %c0_18 = arith.constant 0 : index
    %c0_19 = arith.constant 0 : index
    %c0_20 = arith.constant 0 : index
    %25 = vector.load %arg6[%c0_18, %c0_19, %c0_20] : memref<2x16x256xf32, #tpu.memory_space<vmem>>, vector<2x16x256xf32>
    tpu.vector_store %arg6[%c0_18, %c0_19, %c0_20], %24 {strides = array<i32>} : memref<2x16x256xf32, #tpu.memory_space<vmem>>, vector<2x16x256xf32>,
    return
  }
  func.func @transform_0(%arg0: i32) -> (i32, i32, i32) {
    %c0_i32 = arith.constant 0 : i32
    %c0_i32_0 = arith.constant 0 : i32
    %c0_i32_1 = arith.constant 0 : i32
    return %arg0, %c0_i32, %c0_i32_0 : i32, i32, i32
  }
  func.func @transform_1(%arg0: i32) -> (i32, i32) {
    %c0_i32 = arith.constant 0 : i32
    %c0_i32_0 = arith.constant 0 : i32
    %c0_i32_1 = arith.constant 0 : i32
    return %c0_i32, %c0_i32_0 : i32, i32
  }
  func.func @transform_2(%arg0: i32) -> (i32, i32) {
    %c0_i32 = arith.constant 0 : i32
    %c0_i32_0 = arith.constant 0 : i32
    %c0_i32_1 = arith.constant 0 : i32
    return %c0_i32, %c0_i32_0 : i32, i32
  }
  func.func @transform_3(%arg0: i32) -> (i32, i32) {
    %c0_i32 = arith.constant 0 : i32
    %c0_i32_0 = arith.constant 0 : i32
    %c0_i32_1 = arith.constant 0 : i32
    return %c0_i32, %c0_i32_0 : i32, i32
  }
  func.func @transform_4(%arg0: i32) -> (i32, i32) {
    %c0_i32 = arith.constant 0 : i32
    %c0_i32_0 = arith.constant 0 : i32
    %c0_i32_1 = arith.constant 0 : i32
    return %c0_i32, %c0_i32_0 : i32, i32
  }
  func.func @transform_5(%arg0: i32) -> (i32, i32, i32) {
    %c0_i32 = arith.constant 0 : i32
    %c0_i32_0 = arith.constant 0 : i32
    %c0_i32_1 = arith.constant 0 : i32
    return %arg0, %c0_i32, %c0_i32_0 : i32, i32, i32
  }
}

</mosaic_0001>

<bundles_post_ra>
// kernel: tpu_custom_call.1
= control target key start
LH: loop header
LB: loop body
LE: loop exit
PB: predicated region body
PF: predicated region fallthrough
CT: control target
= control target key end

     0   :  { %10 = vsyncpa [#allocation3], 0  ;;  %s516_s0 = inlined_call_operand.hbm [shape: f32[2,16,256], index: 0, kind: input, shape index: {}]   ;;  %s517_s1 = inlined_call_operand.vmem [shape: f32[16,4], index: 1, kind: input, shape index: {}]   ;;  %s518_s2 = inlined_call_operand.vmem [shape: f32[1,4], index: 2, kind: input, shape index: {}]   ;;  %s519_s3 = inlined_call_operand.vmem [shape: f32[4,16], index: 3, kind: input, shape index: {}]   ;;  %s520_s4 = inlined_call_operand.vmem [shape: f32[1,16], index: 4, kind: input, shape index: {}]   ;;  %s521_s5 = inlined_call_operand.hbm [shape: f32[2,16,256], index: 5, kind: output, shape index: {}]  }
   0x1   :  { %11 = vsyncpa [#allocation4], 0  ;;  %s402_s18 = smov [#allocation2]   ;;  %s354_s22 = scalar_lea.hbm %s516_s0, 1024 }
   0x2   :  { %s17_s19 = sshll.u32 %s402_s18, 4  ;;  %p355_p0 = scmp.ne.s32.totalorder %s516_s0, %s354_s22  ;;  %s18_s19 = int_to_ptr.vmem [resolvable:$true] %s17_s19 }
   0x3   :  { %p358_p1 = scmp.lt.u32.totalorder %s354_s22, %s516_s0 }
   0x5   :  { %p360_p2 = pnand %p358_p1, %p355_p0 }
   0x7   :  { %363 = shalt.err (!%p360_p2)
}
   0x8   :  { %s364_s27 = scalar_lea.vmem %s18_s19, 1024  ;;  %p369_p4 = scmp.lt.s32.totalorder %s18_s19, %s18_s19 }
   0x9   :  { %p365_p3 = scmp.ne.s32.totalorder %s18_s19, %s364_s27  ;;  %p370_p5 = scmp.lt.s32.totalorder %s364_s27, %s364_s27 }
   0xb   :  { %p371_p6 = por %p370_p5, %p369_p4 }
   0xd   :  { %p372_p7 = pnand %p371_p6, %p365_p3 }
   0xf   :  { %375 = shalt.err (!%p372_p7)
}
  0x10   :  { %s403_s28 = smov 256   ;;  %s404_s29 = smov 16  }
  0x11   :  { %23 = dma.hbm_to_vmem [thread:$0]  %s516_s0, 1024, %s18_s19, [#allocation3], %s403_s28, %s403_s28, %s404_s29  }
  0x12   :  { %398 = dma.done.wait [#allocation3], 1024  }
  0x13   :  { %399 = vsyncadd [#allocation3], 4294966272  ;;  %v454_v0 = vld [vmem:[#allocation2 + $0x20] sm:$0xff]  ;;  %v456_v1 = vld [vmem:[#allocation2 + $0x28] sm:$0xff]  ;;  %v405_v15 = vmov 0.0|0.0   ;;  %vm406_vm0 = vmmov 0   ;;  %v72_v17 = vlaneseq }
  0x14   :  { %v458_v2 = vld [vmem:[#allocation2] sm:$0xff]  ;;  %v49_v3 = vadd.f32 %v456_v1, %v454_v0  ;;  %v462_v4 = vld [vmem:[#allocation2 + $0x8] sm:$0xff]  ;;  %v464_v5 = vld [vmem:[#allocation2 + $0x30] sm:$0xff]  ;;  %340 = vmatprep.subr.bf16.mxu0 %v405_v15  ;;  %v407_v16 = vmov 0.0   ;;  %vm83_vm1 = vcmask 130112   ;;  %vm94_vm2 = vcmask 1041409  }
  0x15   :  { %v466_v6 = vld [vmem:[#allocation2 + $0x38] sm:$0xff]  ;;  %v43_v7 = vadd.f32 %v462_v4, %v458_v2  ;;  %v470_v8 = vld [vmem:[#allocation2 + $0x10] sm:$0xff]  ;;  %v59_v12 = vld [vmem:[%s517_s1] sm:$0xff]  ;;  %332 = vmatprep.mubr.msk.f32.mxu0 %vm406_vm0, %v407_v16  ;;  %335 = vmatprep.subr.mxu1 %v407_v16  ;;  %v73_v18 = vand.u32 127, %v72_v17  ;;  %v75_v19 = vshrl.u32 %v72_v17, 7  ;;  %vm96_vm3 = vcmask 130048  }
  0x16   :  { %v472_v9 = vld [vmem:[#allocation2 + $0x18] sm:$0xff]  ;;  %50 = vadd.xlane.f32.xlu1 %v49_v3  ;;  %v52_v10 = vadd.f32 %v466_v6, %v464_v5  ;;  %v60_v13 = vld [vmem:[%s517_s1 + $0x8] sm:$0xff]  ;;  %337 = vmatprep.mubr.msk.f32.mxu1 %vm406_vm0, %v407_v16  ;;  %v170_v38 = vld [vmem:[%s519_s3] sm:$0xf]  ;;  %vm182_vm4 = vcmask 1043456   ;;  %vm178_vm5 = vcmask 31744  }
  0x17   :  { %44 = vadd.xlane.f32.xlu0 %v43_v7  ;;  %v46_v11 = vadd.f32 %v472_v9, %v470_v8  ;;  %v341_v14 = vpack.c.bf16 %v60_v13, %v59_v12  ;;  %v78_v20 = vadd.s32 4294967288, %v73_v18  ;;  %v76_v23 = vsub.s32 %v73_v18, %v75_v19  ;;  %336 = vmatpush3.msk.msra.mxu1 %vm182_vm4, %v170_v38  ;;  %v317_v39 = vld [vmem:[%s518_s2] ss:$0 sm:$0xff]  ;;  %s408_s2 = smov [#allocation5]  }
  0x18   :  { %v319_v44 = vld [vmem:[%s520_s4] ss:$0 sm:$0xff]  ;;  %v264_v51 = vsub.s32 0, %v75_v19  ;;  %v275_v54 = vsub.s32 1, %v75_v19  ;;  %s305_s3 = sshll.u32 %s408_s2, 4  ;;  %s306_s3 = int_to_ptr.vmem [resolvable:$true] %s305_s3 }
  0x19   :  { %342 = vmatpush3.bf16.msra.mxu0 %v341_v14  ;;  %v81_v25 = vsub.s32 %v78_v20, %v75_v19  ;;  %s376_s4 = scalar_lea.vmem %s306_s3, 1024  ;;  %p381_p9 = scmp.lt.s32.totalorder %s306_s3, %s306_s3 }
  0x1a   :  { %53 = vadd.xlane.f32.xlu1 %v52_v10  ;;  %p377_p8 = scmp.ne.s32.totalorder %s306_s3, %s376_s4  ;;  %p382_p10 = scmp.lt.s32.totalorder %s376_s4, %s376_s4 }
  0x1b   :  { %47 = vadd.xlane.f32.xlu0 %v46_v11 }
  0x1c   :  { %p383_p11 = por %p382_p10, %p381_p9 }
  0x1e   :  { %p384_p12 = pnand %p383_p11, %p377_p8 }
  0xa3   :  { %v51_v21 = vpop.xlane.xlu1 %50 }
  0xa4   :  { %v45_v22 = vpop.xlane.xlu0 %44  ;;  %v57_v24 = vmul.f32 0.00390625, %v51_v21 }
  0xa5   :  { %v55_v26 = vmul.f32 0.00390625, %v45_v22 }
  0xa6   :  { %v88_v31 = vrot.slane %v57_v24, %v76_v23 }
  0xa7   :  { %v54_v27 = vpop.xlane.xlu1 %53  ;;  %v77_v33 = vrot.slane %v55_v26, %v76_v23 }
  0xa8   :  { %v58_v28 = vmul.f32 0.00390625, %v54_v27  ;;  %v48_v29 = vpop.xlane.xlu0 %47 }
  0xa9   :  { %v56_v30 = vmul.f32 0.00390625, %v48_v29 }
  0xaa   :  { %v92_v32 = vrot.slane %v58_v28, %v81_v25 }
  0xab   :  { %v82_v34 = vrot.slane %v56_v30, %v81_v25 }
  0xac   :  { %v93_v35 = vsel %vm83_vm1, %v92_v32, %v88_v31 }
  0xad   :  { %v84_v36 = vsel %vm83_vm1, %v82_v34, %v77_v33 }
  0xae   :  { %v95_v37 = vsel %vm94_vm2, %v93_v35, %v84_v36 }
  0xaf   :  { %333 = vmatmul.mubr.msk.f32.vlgmr.msra.gmra.mrb[0].mxu0 %vm96_vm3, %v95_v37 }
 0x182   :  { %v165_v40 = vpop.f32.mrb[0].mxu0 }
 0x183   :  { %v166_v41 = vadd.f32 %v317_v39, %v165_v40  ;;  %v334_v42 = vpop.f32.mrb[1].mxu0 }
 0x185   :  { %v169_v43 = vmax.f32 %v166_v41, 0.0 }
 0x187   :  { %338 = vmatmul.mubr.msk.f32.vlgmr.msra.gmra.mrb[0].mxu1 %vm178_vm5, %v169_v43 }
 0x25a   :  { %v252_v45 = vpop.f32.mrb[0].mxu1 }
 0x25b   :  { %v253_v46 = vadd.f32 %v319_v44, %v252_v45  ;;  %v339_v47 = vpop.f32.mrb[1].mxu1 }
 0x25d   :  { %v322_v48 = vmul.f32 -1.442695, %v253_v46 }
 0x25f   :  { %350 = vpow2.f32 %v322_v48 }
 0x269   :  { %v351_v49 = vpop.eup %350 }
 0x26a   :  { %v259_v50 = vadd.f32 1.0, %v351_v49 }
 0x26c   :  { %352 = vrcp.f32 %v259_v50 }
 0x276   :  { %v353_v52 = vpop.eup %352 }
 0x277   :  { %v265_v53 = vrot.slane %v353_v52, %v264_v51  ;;  %v276_v55 = vrot.slane %v353_v52, %v275_v54 }
 0x279   :  { %271 = vbcast.lane.b32.xlu1 %v265_v53, 264  ;;  %267 = vbcast.lane.b32.xlu0 %v265_v53, 256 }
 0x27d   :  { %278 = vbcast.lane.b32.xlu1 %v276_v55, 256 }
 0x281   :  { %282 = vbcast.lane.b32.xlu1 %v276_v55, 264 }
 0x2eb   :  { %v272_v56 = vpop.permute.xlu1 %271  ;;  %v268_v57 = vpop.permute.xlu0 %267 }
 0x2ec   :  { %v286_v58 = vmul.f32 %v272_v56, %v470_v8  ;;  %v287_v59 = vmul.f32 %v272_v56, %v472_v9  ;;  %v284_v60 = vmul.f32 %v268_v57, %v458_v2  ;;  %v285_v61 = vmul.f32 %v268_v57, %v462_v4 }
 0x2ee   :  { %294 = vst [vmem:[#allocation5 + $0x10] sm:$0xff] %v286_v58  ;;  %295 = vst [vmem:[#allocation5 + $0x18] sm:$0xff] %v287_v59 }
 0x2ef   :  { %292 = vst [vmem:[#allocation5] sm:$0xff] %v284_v60  ;;  %293 = vst [vmem:[#allocation5 + $0x8] sm:$0xff] %v285_v61  ;;  %v279_v62 = vpop.permute.xlu1 %278 }
 0x2f0   :  { %v288_v63 = vmul.f32 %v279_v62, %v454_v0  ;;  %v289_v3 = vmul.f32 %v279_v62, %v456_v1 }
 0x2f2   :  { %296 = vst [vmem:[#allocation5 + $0x20] sm:$0xff] %v288_v63  ;;  %297 = vst [vmem:[#allocation5 + $0x28] sm:$0xff] %v289_v3 }
 0x2f3   :  { %v283_v7 = vpop.permute.xlu1 %282 }
 0x2f4   :  { %v290_v8 = vmul.f32 %v283_v7, %v464_v5  ;;  %v291_v2 = vmul.f32 %v283_v7, %v466_v6 }
 0x2f6   :  { %298 = vst [vmem:[#allocation5 + $0x30] sm:$0xff] %v290_v8  ;;  %299 = vst [vmem:[#allocation5 + $0x38] sm:$0xff] %v291_v2 }
 0x2f7   :  { %387 = shalt.err (!%p384_p12)
}
 0x2f8   :  { %s388_s17 = scalar_lea.hbm %s521_s5, 1024 }
 0x2f9   :  { %p389_p13 = scmp.ne.s32.totalorder %s521_s5, %s388_s17  ;;  %p392_p0 = scmp.lt.u32.totalorder %s388_s17, %s521_s5 }
 0x2fb   :  { %p394_p1 = pnand %p392_p0, %p389_p13 }
 0x2fd   :  { %397 = shalt.err (!%p394_p1)
}
 0x2fe   :  { %311 = dma.vmem_to_hbm [thread:$0]  %s306_s3, 1024, %s521_s5, [#allocation4], %s403_s28, %s403_s28, %s404_s29  }
 0x2ff   :  { %400 = dma.done.wait [#allocation4], 1024  }
 0x300   :  { %401 = vsyncadd [#allocation4], 4294966272 }
 0x301   :  { %315 = vsyncpa [#allocation3], 1 }
 0x302   :  { %316 = vsyncpa [#allocation4], 1 }

</bundles_post_ra>
